<compile_context>
chip_gen: v6e
topology: v6e:2x2x1
jax: 0.10.0
libtpu: 0.0.40
codegen_flags: <defaults>
</compile_context>

<pallas_src>
import jax
import jax.numpy as jnp
from jax.experimental import pallas as pl
from jax.experimental.pallas import tpu as pltpu

LANE = 128        # vreg lane width
ROW_TILE = 32     # row granule: covers f32 (8), bf16 (16), int8/fp8 (32) sublane packing


def _round_up(x, m):
    return (x + m - 1) // m * m


def two_layer_kernel(x_ref, w1_ref, w2_ref, o_ref, acc_ref):
    """One (row-tile, H-chunk) grid step of y = relu(x @ w1) @ w2."""
    k = pl.program_id(1)

    @pl.when(k == 0)
    def _():
        acc_ref[...] = jnp.zeros_like(acc_ref)

    # First matmul: bf16 operands, f32 accumulation on the MXU.
    h = jnp.dot(x_ref[...], w1_ref[...], preferred_element_type=jnp.float32)
    # ReLU (.clamp(min=0)) in f32 on the VPU (v5e has no bf16 VALU path).
    h = jnp.maximum(h, 0.0)
    # Second matmul: cast the activation back to the MXU-friendly compute dtype.
    acc_ref[...] += jnp.dot(h.astype(w2_ref.dtype), w2_ref[...],
                            preferred_element_type=jnp.float32)

    @pl.when(k == pl.num_programs(1) - 1)
    def _():
        o_ref[...] = acc_ref[...].astype(o_ref.dtype)


def two_layer_net(x, w1, w2, *, tile_n=None, compute_dtype=jnp.bfloat16):
    N, D_in = x.shape
    D_in2, H = w1.shape
    H2, D_out = w2.shape
    assert D_in == D_in2 and H == H2

    out_dtype = x.dtype
    cdt_size = jnp.dtype(compute_dtype).itemsize
    out_size = jnp.dtype(out_dtype).itemsize

    # ---- lane-dense padding: every feature dim to a multiple of 128 ----
    Dp = _round_up(D_in, LANE)
    Hp_lane = _round_up(H, LANE)
    # Cap the live (tile_n, h_chunk) f32 intermediate; h_chunk always divides Hp.
    h_chunk = Hp_lane if Hp_lane <= 1024 else 512
    Hp = _round_up(H, h_chunk)
    Dop = _round_up(D_out, LANE)

    # ---- row-tile selection ----
    if tile_n is None:
        if N < 256:
            tile_n = _round_up(N, ROW_TILE)           # single step; tiny batch
        else:
            # >=2 grid steps (v7x has 2 TensorCores); target ~512-row tiles for
            # HBM-roofline efficiency while amortizing ~0.35us/grid-step overhead.
            tile_n = min(512, _round_up(pl.cdiv(N, 2), ROW_TILE))
    tile_n = _round_up(tile_n, ROW_TILE)

    # ---- VMEM working-set estimate; shrink tile_n until it fits v7x's 64 MiB ----
    def vmem_bytes(tn):
        return (2 * tn * Dp * cdt_size            # x tile (double-buffered)
                + 2 * Dp * h_chunk * cdt_size     # w1 chunk (double-buffered)
                + 2 * h_chunk * Dop * cdt_size    # w2 chunk (double-buffered)
                + 2 * tn * Dop * out_size         # out tile (double-buffered)
                + tn * Dop * 4                    # f32 accumulator scratch
                + tn * h_chunk * 4)               # f32 hidden intermediate

    VMEM_BUDGET = 40 * 1024 * 1024
    while vmem_bytes(tile_n) > VMEM_BUDGET and tile_n > ROW_TILE:
        tile_n = _round_up(max(tile_n // 2, ROW_TILE), ROW_TILE)

    Np = _round_up(N, tile_n)
    grid = (Np // tile_n, Hp // h_chunk)

    # ---- pad (zero padding is exact for matmul + ReLU) and cast operands ----
    x_p = jnp.pad(x, ((0, Np - N), (0, Dp - D_in))).astype(compute_dtype)
    w1_p = jnp.pad(w1, ((0, Dp - D_in), (0, Hp - H))).astype(compute_dtype)
    w2_p = jnp.pad(w2, ((0, Hp - H), (0, Dop - D_out))).astype(compute_dtype)

    vmem_limit = max(32 * 1024 * 1024,
                     min(60 * 1024 * 1024,
                         int(vmem_bytes(tile_n) * 1.4) + (4 << 20)))

    cost = pl.CostEstimate(
        flops=2 * N * D_in * H + 2 * N * H * D_out,
        transcendentals=0,
        bytes_accessed=(x.size + w1.size + w2.size) * cdt_size + N * D_out * out_size,
    )

    y_p = pl.pallas_call(
        two_layer_kernel,
        out_shape=jax.ShapeDtypeStruct((Np, Dop), out_dtype),
        grid_spec=pltpu.PrefetchScalarGridSpec(
            num_scalar_prefetch=0,
            grid=grid,
            in_specs=[
                pl.BlockSpec((tile_n, Dp), lambda i, k: (i, 0)),     # x row tile
                pl.BlockSpec((Dp, h_chunk), lambda i, k: (0, k)),    # w1 H-chunk
                pl.BlockSpec((h_chunk, Dop), lambda i, k: (k, 0)),   # w2 H-chunk
            ],
            out_specs=pl.BlockSpec((tile_n, Dop), lambda i, k: (i, 0)),
            scratch_shapes=[pltpu.VMEM((tile_n, Dop), jnp.float32)],
        ),
        compiler_params=pltpu.CompilerParams(
            dimension_semantics=("parallel", "arbitrary"),
            vmem_limit_bytes=vmem_limit,
        ),
        cost_estimate=cost,
    )(x_p, w1_p, w2_p)

    return y_p[:N, :D_out]


def reference_f32(x, w1, w2):
    return jnp.maximum(x @ w1, 0.0) @ w2


def reference_bf16(x, w1, w2):
    # Same numerics as the kernel: bf16 operands, f32 accumulation, f32 ReLU.
    h = jnp.dot(x.astype(jnp.bfloat16), w1.astype(jnp.bfloat16),
                preferred_element_type=jnp.float32)
    h = jnp.maximum(h, 0.0)
    return jnp.dot(h.astype(jnp.bfloat16), w2.astype(jnp.bfloat16),
                   preferred_element_type=jnp.float32)


if __name__ == "__main__":
    # Shapes implied by the module: x: (N, D_in), hidden H, output D_out (kept small).
    N, D_in, H, D_out = 8, 64, 32, 16

    key = jax.random.PRNGKey(0)
    kx, k1, k2 = jax.random.split(key, 3)

    x = jax.random.normal(kx, (N, D_in), dtype=jnp.float32)

    # Deterministic init mimicking torch.nn.Linear default (uniform +-1/sqrt(fan_in)),
    # stored pre-transposed as documented in the layout comment.
    b1 = 1.0 / jnp.sqrt(jnp.float32(D_in))
    b2 = 1.0 / jnp.sqrt(jnp.float32(H))
    w1 = jax.random.uniform(k1, (D_in, H), dtype=jnp.float32, minval=-b1, maxval=b1)
    w2 = jax.random.uniform(k2, (H, D_out), dtype=jnp.float32, minval=-b2, maxval=b2)

    y = jax.block_until_ready(two_layer_net(x, w1, w2))

    y_ref16 = reference_bf16(x, w1, w2)   # same compute dtype as the kernel
    y_ref32 = reference_f32(x, w1, w2)    # full-precision torch-equivalent semantics

    assert y.shape == (N, D_out)
    assert jnp.allclose(y, y_ref16, atol=2e-3, rtol=2e-3)
    assert jnp.allclose(y, y_ref32, atol=3e-2, rtol=3e-2)

    print("KERNEL_OK")
</pallas_src>

<mosaic_0001>
module attributes {stable_mosaic.version = 11 : i64} {
  func.func @two_layer_kernel(%arg0: i32, %arg1: i32, %arg2: memref<32x128xbf16, #tpu.memory_space<vmem>>, %arg3: memref<128x128xbf16, #tpu.memory_space<vmem>>, %arg4: memref<128x128xbf16, #tpu.memory_space<vmem>>, %arg5: memref<32x128xf32, #tpu.memory_space<vmem>>, %arg6: memref<32x128xf32, #tpu.memory_space<vmem>>) attributes {dimension_semantics = [#tpu.dimension_semantics<parallel>, #tpu.dimension_semantics<arbitrary>], iteration_bounds = array<i64: 1, 1>, scalar_prefetch = 0 : i64, scratch_operands = 1 : i64, tpu.core_type = #tpu.core_type<tc>, window_params = [{transform_indices = @transform_0, window_bounds = array<i64: 32, 128>}, {transform_indices = @transform_1, window_bounds = array<i64: 128, 128>}, {transform_indices = @transform_2, window_bounds = array<i64: 128, 128>}, {transform_indices = @transform_3, window_bounds = array<i64: 32, 128>}]} {
    %c0_i32 = arith.constant 0 : i32
    %0 = arith.cmpi eq, %arg1, %c0_i32 : i32
    %1 = arith.extui %0 : i1 to i32
    %c0_i32_0 = arith.constant 0 : i32
    %2 = arith.cmpi ne, %1, %c0_i32_0 : i32
    scf.if %2 {
      %cst_14 = arith.constant 0.000000e+00 : f32
      %17 = vector.broadcast %cst_14 : f32 to vector<32x128xf32>
      %c0_15 = arith.constant 0 : index
      %c0_16 = arith.constant 0 : index
      %18 = vector.load %arg6[%c0_15, %c0_16] : memref<32x128xf32, #tpu.memory_space<vmem>>, vector<32x128xf32>
      tpu.vector_store %arg6[%c0_15, %c0_16], %17 {strides = array<i32>} : memref<32x128xf32, #tpu.memory_space<vmem>>, vector<32x128xf32>,
    } else {
    }
    %c0 = arith.constant 0 : index
    %c0_1 = arith.constant 0 : index
    %3 = vector.load %arg2[%c0, %c0_1] : memref<32x128xbf16, #tpu.memory_space<vmem>>, vector<32x128xbf16>
    %c0_2 = arith.constant 0 : index
    %c0_3 = arith.constant 0 : index
    %4 = vector.load %arg3[%c0_2, %c0_3] : memref<128x128xbf16, #tpu.memory_space<vmem>>, vector<128x128xbf16>
    %cst = arith.constant dense<0.000000e+00> : vector<32x128xf32>
    %5 = tpu.matmul %3, %4, %cst {dimension_numbers = #tpu.dot_dimension_numbers<[1], [0], [0], [1], [0, 0, 1, 1], [], []>} : vector<32x128xbf16>, vector<128x128xbf16>, vector<32x128xf32> -> vector<32x128xf32>
    %cst_4 = arith.constant 0.000000e+00 : f32
    %6 = vector.broadcast %cst_4 : f32 to vector<32x128xf32>
    %7 = arith.maximumf %5, %6 : vector<32x128xf32>
    %c0_5 = arith.constant 0 : index
    %c0_6 = arith.constant 0 : index
    %8 = vector.load %arg6[%c0_5, %c0_6] : memref<32x128xf32, #tpu.memory_space<vmem>>, vector<32x128xf32>
    %9 = arith.truncf %7 : vector<32x128xf32> to vector<32x128xbf16>
    %c0_7 = arith.constant 0 : index
    %c0_8 = arith.constant 0 : index
    %10 = vector.load %arg4[%c0_7, %c0_8] : memref<128x128xbf16, #tpu.memory_space<vmem>>, vector<128x128xbf16>
    %cst_9 = arith.constant dense<0.000000e+00> : vector<32x128xf32>
    %11 = tpu.matmul %9, %10, %cst_9 {dimension_numbers = #tpu.dot_dimension_numbers<[1], [0], [0], [1], [0, 0, 1, 1], [], []>} : vector<32x128xbf16>, vector<128x128xbf16>, vector<32x128xf32> -> vector<32x128xf32>
    %12 = arith.addf %8, %11 : vector<32x128xf32>
    %c0_10 = arith.constant 0 : index
    %c0_11 = arith.constant 0 : index
    %13 = vector.load %arg6[%c0_10, %c0_11] : memref<32x128xf32, #tpu.memory_space<vmem>>, vector<32x128xf32>
    tpu.vector_store %arg6[%c0_10, %c0_11], %12 {strides = array<i32>} : memref<32x128xf32, #tpu.memory_space<vmem>>, vector<32x128xf32>,
    %c0_i32_12 = arith.constant 0 : i32
    %14 = arith.cmpi eq, %arg1, %c0_i32_12 : i32
    %15 = arith.extui %14 : i1 to i32
    %c0_i32_13 = arith.constant 0 : i32
    %16 = arith.cmpi ne, %15, %c0_i32_13 : i32
    scf.if %16 {
      %c0_14 = arith.constant 0 : index
      %c0_15 = arith.constant 0 : index
      %17 = vector.load %arg6[%c0_14, %c0_15] : memref<32x128xf32, #tpu.memory_space<vmem>>, vector<32x128xf32>
      %c0_16 = arith.constant 0 : index
      %c0_17 = arith.constant 0 : index
      %18 = vector.load %arg5[%c0_16, %c0_17] : memref<32x128xf32, #tpu.memory_space<vmem>>, vector<32x128xf32>
      tpu.vector_store %arg5[%c0_16, %c0_17], %17 {strides = array<i32>} : memref<32x128xf32, #tpu.memory_space<vmem>>, vector<32x128xf32>,
    } else {
    }
    return
  }
  func.func @transform_0(%arg0: i32, %arg1: i32) -> (i32, i32) {
    %c0_i32 = arith.constant 0 : i32
    %c0_i32_0 = arith.constant 0 : i32
    return %arg0, %c0_i32 : i32, i32
  }
  func.func @transform_1(%arg0: i32, %arg1: i32) -> (i32, i32) {
    %c0_i32 = arith.constant 0 : i32
    %c0_i32_0 = arith.constant 0 : i32
    return %c0_i32, %arg1 : i32, i32
  }
  func.func @transform_2(%arg0: i32, %arg1: i32) -> (i32, i32) {
    %c0_i32 = arith.constant 0 : i32
    %c0_i32_0 = arith.constant 0 : i32
    return %arg1, %c0_i32 : i32, i32
  }
  func.func @transform_3(%arg0: i32, %arg1: i32) -> (i32, i32) {
    %c0_i32 = arith.constant 0 : i32
    %c0_i32_0 = arith.constant 0 : i32
    return %arg0, %c0_i32 : i32, i32
  }
}

</mosaic_0001>

<bundles_post_ra>
// kernel: tpu_custom_call.1
= control target key start
LH: loop header
LB: loop body
LE: loop exit
PB: predicated region body
PF: predicated region fallthrough
CT: control target
= control target key end

     0   :  { %8 = vsyncpa [#allocation4], 0  ;;  %s584_s0 = inlined_call_operand.hbm [shape: bf16[32,128], index: 0, kind: input, shape index: {}]   ;;  %s585_s1 = inlined_call_operand.hbm [shape: bf16[128,128], index: 1, kind: input, shape index: {}]   ;;  %s586_s2 = inlined_call_operand.hbm [shape: bf16[128,128], index: 2, kind: input, shape index: {}]   ;;  %s587_s3 = inlined_call_operand.hbm [shape: f32[32,128], index: 3, kind: output, shape index: {}]  }
   0x1   :  { %9 = vsyncpa [#allocation7], 0 }
   0x2   :  { %10 = vsyncpa [#allocation5], 0  ;;  %s544_s12 = smov [#allocation6]   ;;  %s545_s14 = smov [#allocation3]  }
   0x3   :  { %s28_s13 = sshll.u32 %s544_s12, 4  ;;  %s16_s15 = sshll.u32 %s545_s14, 4  ;;  %s29_s13 = int_to_ptr.vmem [resolvable:$true] %s28_s13  ;;  %s17_s15 = int_to_ptr.vmem [resolvable:$true] %s16_s15 }
   0x4   :  { %s466_s16 = scalar_lea.vmem %s29_s13, 1024  ;;  %p471_p1 = scmp.lt.s32.totalorder %s29_s13, %s29_s13 }
   0x5   :  { %p467_p0 = scmp.ne.s32.totalorder %s29_s13, %s466_s16  ;;  %p472_p2 = scmp.lt.s32.totalorder %s466_s16, %s466_s16 }
   0x7   :  { %p473_p3 = por %p472_p2, %p471_p1 }
   0x9   :  { %p474_p4 = pnand %p473_p3, %p467_p0 }
   0xb   :  { %477 = shalt.err (!%p474_p4)
}
   0xc   :  { %s546_s17 = smov 64   ;;  %s547_s18 = smov 4  }
   0xd   :  { %34 = dma.hbm_to_vmem [thread:$0]  %s585_s1, 1024, %s29_s13, [#allocation7], %s546_s17, %s546_s17, %s547_s18  }
   0xe   :  { %s486_s21 = scalar_lea.vmem %s17_s15, 256  ;;  %p491_p6 = scmp.lt.s32.totalorder %s17_s15, %s17_s15 }
   0xf   :  { %p487_p5 = scmp.ne.s32.totalorder %s17_s15, %s486_s21  ;;  %p492_p7 = scmp.lt.s32.totalorder %s486_s21, %s486_s21 }
  0x11   :  { %p493_p8 = por %p492_p7, %p491_p6 }
  0x13   :  { %p494_p9 = pnand %p493_p8, %p487_p5 }
  0x15   :  { %497 = shalt.err (!%p494_p9)
}
  0x16   :  { %22 = dma.hbm_to_vmem [thread:$0]  %s584_s0, 256, %s17_s15, [#allocation4], %s546_s17, %s546_s17, %s547_s18  }
  0x17   :  { %s548_s24 = smov [#allocation8]  }
  0x18   :  { %s40_s25 = sshll.u32 %s548_s24, 4  ;;  %s41_s25 = int_to_ptr.vmem [resolvable:$true] %s40_s25 }
  0x19   :  { %s506_s26 = scalar_lea.vmem %s41_s25, 1024  ;;  %p511_p11 = scmp.lt.s32.totalorder %s41_s25, %s41_s25 }
  0x1a   :  { %p507_p10 = scmp.ne.s32.totalorder %s41_s25, %s506_s26  ;;  %p512_p12 = scmp.lt.s32.totalorder %s506_s26, %s506_s26 }
  0x1c   :  { %p513_p13 = por %p512_p12, %p511_p11 }
  0x1e   :  { %p514_p0 = pnand %p513_p13, %p507_p10 }
  0x20   :  { %517 = shalt.err (!%p514_p0)
}
  0x21   :  { %46 = dma.hbm_to_vmem [thread:$0]  %s586_s2, 1024, %s41_s25, [#allocation7], %s546_s17, %s546_s17, %s547_s18  }
  0x22   :  { %538 = dma.done.wait [#allocation4], 256  }
  0x23   :  { %539 = vsyncadd [#allocation4], 4294967040 }
  0x24   :  { %540 = dma.done.wait [#allocation7], 2048  }
  0x25   :  { %541 = vsyncadd [#allocation7], 4294965248  ;;  %v440_v0 = vld [vmem:[#allocation6 + $0x38] sm:$0xff]   ;;  %v441_v1 = vld [vmem:[#allocation6 + $0x30] sm:$0xff]   ;;  %s549_s0 = smov [#allocation9]  }
  0x26   :  { %392 = vmatprep.subr.bf16.mxu0 %v440_v0  ;;  %v442_v2 = vld [vmem:[#allocation6 + $0x28] sm:$0xff]   ;;  %v443_v3 = vld [vmem:[#allocation6 + $0x20] sm:$0xff]   ;;  %v448_v4 = vld [vmem:[#allocation3] sm:$0xff]   ;;  %s341_s2 = sshll.u32 %s549_s0, 4  ;;  %s342_s2 = int_to_ptr.vmem [resolvable:$true] %s341_s2 }
  0x27   :  { %393 = vmatpush3.bf16.msra.mxu0 %v440_v0  ;;  %408 = vmatprep.mubr.bf16.mxu0 %v448_v4  ;;  %v450_v5 = vld [vmem:[#allocation8 + $0x38] sm:$0xff]   ;;  %v451_v6 = vld [vmem:[#allocation8 + $0x30] sm:$0xff]   ;;  %v452_v9 = vld [vmem:[#allocation8 + $0x28] sm:$0xff]   ;;  %s518_s28 = scalar_lea.vmem %s342_s2, 512  ;;  %p523_p2 = scmp.lt.s32.totalorder %s342_s2, %s342_s2 }
  0x28   :  { %394 = vmatprep.subr.bf16.mxu0 %v441_v1  ;;  %v444_v7 = vld [vmem:[#allocation6 + $0x18] sm:$0xff]   ;;  %412 = vmatprep.subr.bf16.mxu1 %v450_v5  ;;  %v445_v8 = vld [vmem:[#allocation6 + $0x10] sm:$0xff]   ;;  %v453_v10 = vld [vmem:[#allocation8 + $0x20] sm:$0xff]   ;;  %p519_p1 = scmp.ne.s32.totalorder %s342_s2, %s518_s28  ;;  %p524_p3 = scmp.lt.s32.totalorder %s518_s28, %s518_s28 }
  0x29   :  { %413 = vmatpush3.bf16.msra.mxu1 %v450_v5  ;;  %v446_v11 = vld [vmem:[#allocation6 + $0x8] sm:$0xff]   ;;  %v454_v12 = vld [vmem:[#allocation8 + $0x18] sm:$0xff]   ;;  %v447_v13 = vld [vmem:[#allocation6] sm:$0xff]  }
  0x2a   :  { %414 = vmatprep.subr.bf16.mxu1 %v451_v6  ;;  %v449_v14 = vld [vmem:[#allocation3 + $0x8] sm:$0xff]   ;;  %v455_v15 = vld [vmem:[#allocation8 + $0x10] sm:$0xff]   ;;  %v456_v16 = vld [vmem:[#allocation8 + $0x8] sm:$0xff]   ;;  %p525_p4 = por %p524_p3, %p523_p2 }
  0x2b   :  { %395 = vmatpush3.bf16.msra.mxu0 %v441_v1  ;;  %v457_v17 = vld [vmem:[#allocation8] sm:$0xff]  }
  0x2c   :  { %396 = vmatprep.subr.bf16.mxu0 %v442_v2  ;;  %p526_p5 = pnand %p525_p4, %p519_p1 }
  0x2d   :  { %415 = vmatpush3.bf16.msra.mxu1 %v451_v6 }
  0x2e   :  { %416 = vmatprep.subr.bf16.mxu1 %v452_v9 }
  0x2f   :  { %397 = vmatpush3.bf16.msra.mxu0 %v442_v2 }
  0x30   :  { %398 = vmatprep.subr.bf16.mxu0 %v443_v3 }
  0x31   :  { %417 = vmatpush3.bf16.msra.mxu1 %v452_v9 }
  0x32   :  { %418 = vmatprep.subr.bf16.mxu1 %v453_v10 }
  0x33   :  { %399 = vmatpush3.bf16.msra.mxu0 %v443_v3 }
  0x34   :  { %400 = vmatprep.subr.bf16.mxu0 %v444_v7 }
  0x35   :  { %419 = vmatpush3.bf16.msra.mxu1 %v453_v10 }
  0x36   :  { %420 = vmatprep.subr.bf16.mxu1 %v454_v12 }
  0x37   :  { %401 = vmatpush3.bf16.msra.mxu0 %v444_v7 }
  0x38   :  { %402 = vmatprep.subr.bf16.mxu0 %v445_v8 }
  0x39   :  { %421 = vmatpush3.bf16.msra.mxu1 %v454_v12 }
  0x3a   :  { %422 = vmatprep.subr.bf16.mxu1 %v455_v15 }
  0x3b   :  { %403 = vmatpush3.bf16.msra.mxu0 %v445_v8 }
  0x3c   :  { %404 = vmatprep.subr.bf16.mxu0 %v446_v11 }
  0x3d   :  { %423 = vmatpush3.bf16.msra.mxu1 %v455_v15 }
  0x3e   :  { %424 = vmatprep.subr.bf16.mxu1 %v456_v16 }
  0x3f   :  { %405 = vmatpush3.bf16.msra.mxu0 %v446_v11 }
  0x40   :  { %406 = vmatprep.subr.bf16.mxu0 %v447_v13 }
  0x41   :  { %425 = vmatpush3.bf16.msra.mxu1 %v456_v16 }
  0x42   :  { %426 = vmatprep.subr.bf16.mxu1 %v457_v17 }
  0x43   :  { %407 = vmatpush3.bf16.msra.mxu0 %v447_v13 }
  0x45   :  { %427 = vmatpush3.bf16.msra.mxu1 %v457_v17 }
  0x46   :  { %409 = vmatmul.mubr.bf16.vlgmr.msra.gmra.mxu0 %v449_v14 }
 0x106   :  { %v410_v18 = vpop.f32.mrf.mxu0 }
 0x107   :  { %v196_v25 = vmax.f32 %v410_v18, 0.0 }
 0x108   :  { %v179_v19 = vpop.f32.mrf.mxu0 }
 0x109   :  { %v194_v23 = vmax.f32 %v179_v19, 0.0 }
 0x10a   :  { %v411_v20 = vpop.f32.mrf.mxu0 }
 0x10b   :  { %v197_v21 = vmax.f32 %v411_v20, 0.0 }
 0x10c   :  { %v182_v22 = vpop.f32.mrf.mxu0 }
 0x10d   :  { %v195_v24 = vmax.f32 %v182_v22, 0.0  ;;  %v203_v27 = vpack.c.bf16 %v197_v21, %v196_v25 }
 0x10f   :  { %v202_v26 = vpack.c.bf16 %v195_v24, %v194_v23 }
 0x111   :  { %428 = vmatprep.mubr.bf16.mxu1 %v202_v26 }
 0x112   :  { %429 = vmatmul.mubr.bf16.vlgmr.msra.gmra.mxu1 %v203_v27 }
 0x1d2   :  { %v430_v28 = vpop.f32.mrf.mxu1 }
 0x1d3   :  { %334 = vst [vmem:[#allocation9 + $0x10] sm:$0xff] %v430_v28 }
 0x1d4   :  { %v302_v29 = vpop.f32.mrf.mxu1 }
 0x1d5   :  { %332 = vst [vmem:[#allocation9] sm:$0xff] %v302_v29 }
 0x1d6   :  { %v431_v30 = vpop.f32.mrf.mxu1 }
 0x1d7   :  { %335 = vst [vmem:[#allocation9 + $0x18] sm:$0xff] %v431_v30 }
 0x1d8   :  { %v305_v31 = vpop.f32.mrf.mxu1 }
 0x1d9   :  { %333 = vst [vmem:[#allocation9 + $0x8] sm:$0xff] %v305_v31 }
 0x1da   :  { %529 = shalt.err (!%p526_p5)
}
 0x1db   :  { %s550_s29 = smov 128   ;;  %s551_s30 = smov 8  }
 0x1dc   :  { %347 = dma.vmem_to_hbm [thread:$0]  %s342_s2, 512, %s587_s3, [#allocation5], %s550_s29, %s550_s29, %s551_s30  }
 0x1dd   :  { %542 = dma.done.wait [#allocation5], 512  }
 0x1de   :  { %543 = vsyncadd [#allocation5], 4294966784 }
 0x1df   :  { %351 = vsyncpa [#allocation4], 1 }
 0x1e0   :  { %352 = vsyncpa [#allocation7], 1 }
 0x1e1   :  { %353 = vsyncpa [#allocation5], 1 }

</bundles_post_ra>
